<compile_context>
chip_gen: v7x
topology: tpu7x:2x2x1
jax: 0.10.0
libtpu: 0.0.40
codegen_flags: <defaults>
</compile_context>

<pallas_src>
import jax
import jax.numpy as jnp
from jax.experimental import pallas as pl
from jax.experimental.pallas import tpu as pltpu

INPUT_SIZE = 7 * 7 * 3   # 147
HIDDEN = 64
LANE = 128


def _round_up(n, m):
    return ((n + m - 1) // m) * m


# ---------------------------------------------------------------------------
# Pallas kernel: fused 2-layer MLP (Linear+ReLU, Linear+ReLU)
# ---------------------------------------------------------------------------
def _embed_kernel(x_ref, w1_ref, b1_ref, w2_ref, b2_ref, out_ref):
    cdt = w1_ref.dtype                               # MXU operand dtype (f32/bf16)
    x = x_ref[...].astype(cdt)                       # in-kernel widen of bf16/int8 stream
    h1 = jnp.dot(x, w1_ref[...], preferred_element_type=jnp.float32)
    h1 = jnp.maximum(h1 + b1_ref[...].astype(jnp.float32), 0.0)     # ReLU, f32 VPU
    h2 = jnp.dot(h1.astype(cdt), w2_ref[...], preferred_element_type=jnp.float32)
    h2 = jnp.maximum(h2 + b2_ref[...].astype(jnp.float32), 0.0)     # ReLU
    out_ref[...] = h2.astype(out_ref.dtype)                         # [TB, 64]


def _pick_tile(B, tile_b):
    """Pick a batch tile: big (HBM-bound kernel), multiple of 8, and giving
    the grid >= 2 steps when B allows so both v7x TensorCores get work."""
    half = _round_up(pl.cdiv(B, 2), 8)
    tb = max(8, _round_up(min(int(tile_b), half), 8))
    if tb >= B:
        tb = B        # single block == full batch dim (always a legal block shape)
    return tb


def embedding_forward(next_obs, params, *, tile_b=2048, out_dtype=jnp.float32):
    """Pallas-backed forward of EmbeddingNetwork_RAPID.

    next_obs:  [B, 7, 7, 3] (or already-flat [B, 147]); f32 / bf16 / int8 / uint8.
    params:    dict with w1 [147,64], b1 [1,64], w2 [64,64], b2 [1,64]
               (weights stored as [in, out] for x @ W on the MXU).
    out_dtype: dtype of returned features (f32 by default, like the torch module;
               pass bf16 to halve the output HBM stream).
    Returns:   [B, 64] features in out_dtype.
    """
    B = next_obs.shape[0]
    x = next_obs.reshape(B, -1)                      # free row-major flatten
    in_feat = x.shape[1]
    out_feat = params["w2"].shape[1]
    assert in_feat == params["w1"].shape[0]

    tb = _pick_tile(B, tile_b)
    grid = (pl.cdiv(B, tb),)                         # ragged last block: masked writeback

    # Explicit scoped-VMEM budget sized from the tile (v5e default is only 16 MiB,
    # v7x physical is 64 MiB) — double-buffered input/output streams + f32
    # intermediates + weights, with headroom.
    x_item = jnp.dtype(x.dtype).itemsize
    out_item = jnp.dtype(out_dtype).itemsize
    in_pad = _round_up(in_feat, LANE)
    out_pad = _round_up(out_feat, LANE)
    hid_pad = _round_up(HIDDEN, LANE)
    w_bytes = sum(int(v.size) * jnp.dtype(v.dtype).itemsize for v in params.values())
    vmem_need = (2 * tb * in_pad * x_item            # double-buffered x blocks
                 + 2 * tb * out_pad * out_item       # double-buffered output blocks
                 + 2 * tb * hid_pad * 4              # h1/h2 f32 intermediates
                 + 2 * w_bytes)                      # weights (default double-buffered)
    vmem_limit = int(min(max(vmem_need * 5 // 4 + (4 << 20), 16 << 20), 64 << 20))

    flops = 2 * B * (in_feat * HIDDEN + HIDDEN * out_feat)
    bytes_accessed = (B * in_feat * x_item + B * out_feat * out_item + w_bytes)

    return pl.pallas_call(
        _embed_kernel,
        out_shape=jax.ShapeDtypeStruct((B, out_feat), out_dtype),
        grid=grid,
        in_specs=[
            # activations: streamed per batch tile
            pl.BlockSpec((tb, in_feat), lambda i: (i, 0)),
            # weights/biases: constant block index -> VMEM-resident across steps
            pl.BlockSpec(params["w1"].shape, lambda i: (0, 0)),
            pl.BlockSpec(params["b1"].shape, lambda i: (0, 0)),
            pl.BlockSpec(params["w2"].shape, lambda i: (0, 0)),
            pl.BlockSpec(params["b2"].shape, lambda i: (0, 0)),
        ],
        out_specs=pl.BlockSpec((tb, out_feat), lambda i: (i, 0)),
        compiler_params=pltpu.CompilerParams(
            dimension_semantics=("parallel",),
            vmem_limit_bytes=vmem_limit,
        ),
        cost_estimate=pl.CostEstimate(
            flops=flops, transcendentals=0, bytes_accessed=bytes_accessed),
    )(x, params["w1"], params["b1"], params["w2"], params["b2"])


# ---------------------------------------------------------------------------
# Deterministic parameter init (mirrors nn.init.orthogonal_ + zero bias)
# ---------------------------------------------------------------------------
def _orthogonal(key, out_dim, in_dim, gain=1.0):
    # Matches torch.nn.init.orthogonal_ semantics for a 2-D weight [out, in].
    a = jax.random.normal(key, (out_dim, in_dim), dtype=jnp.float32)
    transposed = out_dim < in_dim
    if transposed:
        a = a.T
    q, r = jnp.linalg.qr(a)
    d = jnp.sign(jnp.diagonal(r))
    q = q * d[None, :]
    if transposed:
        q = q.T
    return gain * q                                                 # [out_dim, in_dim]


def make_params(key, dtype=jnp.float32):
    k1, k2 = jax.random.split(key, 2)
    relu_gain = float(jnp.sqrt(2.0))                                # calculate_gain('relu')
    w1 = _orthogonal(k1, HIDDEN, INPUT_SIZE, gain=relu_gain)        # torch layout [64, 147]
    w2 = _orthogonal(k2, HIDDEN, HIDDEN, gain=relu_gain)            # [64, 64]
    return {
        # transpose to [in, out] for x @ W inside the kernel
        "w1": w1.T.astype(dtype), "b1": jnp.zeros((1, HIDDEN), dtype),
        "w2": w2.T.astype(dtype), "b2": jnp.zeros((1, HIDDEN), dtype),
    }


# ---------------------------------------------------------------------------
# Pure-JAX reference for sanity checking
# ---------------------------------------------------------------------------
def reference_forward(next_obs, params):
    x = next_obs.reshape(next_obs.shape[0], -1).astype(jnp.float32)
    h1 = jnp.maximum(x @ params["w1"].astype(jnp.float32)
                     + params["b1"].astype(jnp.float32), 0.0)
    h2 = jnp.maximum(h1 @ params["w2"].astype(jnp.float32)
                     + params["b2"].astype(jnp.float32), 0.0)
    return h2


if __name__ == "__main__":
    key = jax.random.PRNGKey(0)
    k_params, k_obs = jax.random.split(key)
    params = make_params(k_params)

    # MiniGrid-like observation embedding: next_obs [B, 7, 7, 3]
    batch = 10
    next_obs = jax.random.normal(k_obs, (batch, 7, 7, 3), dtype=jnp.float32)

    # f32 path (2 grid steps, ragged last block — no wrapper pad/slice).
    feat = jax.block_until_ready(embedding_forward(next_obs, params))
    ref = reference_forward(next_obs, params)
    assert feat.shape == (batch, HIDDEN) and feat.dtype == jnp.float32
    assert jnp.allclose(feat, ref, atol=1e-4, rtol=1e-4)

    # bf16 observation stream (halves the dominant HBM read); features stay f32.
    obs_bf16 = next_obs.astype(jnp.bfloat16)
    feat_bf16 = jax.block_until_ready(embedding_forward(obs_bf16, params))
    ref_bf16 = reference_forward(obs_bf16.astype(jnp.float32), params)
    assert feat_bf16.dtype == jnp.float32
    assert jnp.allclose(feat_bf16, ref_bf16, atol=1e-4, rtol=1e-4)

    # Multi-step pipelined grid with a ragged tail on a larger batch.
    batch2 = 20
    next_obs2 = jax.random.normal(jax.random.PRNGKey(1), (batch2, 7, 7, 3),
                                  dtype=jnp.float32)
    feat2 = jax.block_until_ready(embedding_forward(next_obs2, params, tile_b=8))
    ref2 = reference_forward(next_obs2, params)
    assert feat2.shape == (batch2, HIDDEN)
    assert jnp.allclose(feat2, ref2, atol=1e-4, rtol=1e-4)

    print("KERNEL_OK")
</pallas_src>

<mosaic_0001>
module attributes {stable_mosaic.version = 11 : i64} {
  func.func @_embed_kernel(%arg0: i32, %arg1: memref<8x147xf32, #tpu.memory_space<vmem>>, %arg2: memref<147x64xf32, #tpu.memory_space<vmem>>, %arg3: memref<1x64xf32, #tpu.memory_space<vmem>>, %arg4: memref<64x64xf32, #tpu.memory_space<vmem>>, %arg5: memref<1x64xf32, #tpu.memory_space<vmem>>, %arg6: memref<8x64xf32, #tpu.memory_space<vmem>>) attributes {dimension_semantics = [#tpu.dimension_semantics<parallel>], iteration_bounds = array<i64: 2>, scalar_prefetch = 0 : i64, scratch_operands = 0 : i64, tpu.core_type = #tpu.core_type<tc>, window_params = [{transform_indices = @transform_0, window_bounds = array<i64: 8, 147>}, {pipeline_mode = #tpu.pipeline_mode<synchronous>, transform_indices = @transform_1, window_bounds = array<i64: 147, 64>}, {pipeline_mode = #tpu.pipeline_mode<synchronous>, transform_indices = @transform_2, window_bounds = array<i64: 1, 64>}, {pipeline_mode = #tpu.pipeline_mode<synchronous>, transform_indices = @transform_3, window_bounds = array<i64: 64, 64>}, {pipeline_mode = #tpu.pipeline_mode<synchronous>, transform_indices = @transform_4, window_bounds = array<i64: 1, 64>}, {transform_indices = @transform_5, window_bounds = array<i64: 8, 64>}]} {
    %c0 = arith.constant 0 : index
    %c0_0 = arith.constant 0 : index
    %0 = vector.load %arg1[%c0, %c0_0] : memref<8x147xf32, #tpu.memory_space<vmem>>, vector<8x147xf32>
    %c0_1 = arith.constant 0 : index
    %c0_2 = arith.constant 0 : index
    %1 = vector.load %arg2[%c0_1, %c0_2] : memref<147x64xf32, #tpu.memory_space<vmem>>, vector<147x64xf32>
    %cst = arith.constant dense<0.000000e+00> : vector<8x64xf32>
    %2 = tpu.matmul %0, %1, %cst {dimension_numbers = #tpu.dot_dimension_numbers<[1], [0], [0], [1], [0, 0, 1, 1], [], []>} : vector<8x147xf32>, vector<147x64xf32>, vector<8x64xf32> -> vector<8x64xf32>
    %c0_3 = arith.constant 0 : index
    %c0_4 = arith.constant 0 : index
    %3 = vector.load %arg3[%c0_3, %c0_4] : memref<1x64xf32, #tpu.memory_space<vmem>>, vector<1x64xf32>
    %4 = vector.broadcast %3 : vector<1x64xf32> to vector<8x64xf32>
    %5 = arith.addf %2, %4 : vector<8x64xf32>
    %cst_5 = arith.constant 0.000000e+00 : f32
    %6 = vector.broadcast %cst_5 : f32 to vector<8x64xf32>
    %7 = arith.maximumf %5, %6 : vector<8x64xf32>
    %c0_6 = arith.constant 0 : index
    %c0_7 = arith.constant 0 : index
    %8 = vector.load %arg4[%c0_6, %c0_7] : memref<64x64xf32, #tpu.memory_space<vmem>>, vector<64x64xf32>
    %cst_8 = arith.constant dense<0.000000e+00> : vector<8x64xf32>
    %9 = tpu.matmul %7, %8, %cst_8 {dimension_numbers = #tpu.dot_dimension_numbers<[1], [0], [0], [1], [0, 0, 1, 1], [], []>} : vector<8x64xf32>, vector<64x64xf32>, vector<8x64xf32> -> vector<8x64xf32>
    %c0_9 = arith.constant 0 : index
    %c0_10 = arith.constant 0 : index
    %10 = vector.load %arg5[%c0_9, %c0_10] : memref<1x64xf32, #tpu.memory_space<vmem>>, vector<1x64xf32>
    %11 = vector.broadcast %10 : vector<1x64xf32> to vector<8x64xf32>
    %12 = arith.addf %9, %11 : vector<8x64xf32>
    %cst_11 = arith.constant 0.000000e+00 : f32
    %13 = vector.broadcast %cst_11 : f32 to vector<8x64xf32>
    %14 = arith.maximumf %12, %13 : vector<8x64xf32>
    %c0_12 = arith.constant 0 : index
    %c0_13 = arith.constant 0 : index
    %15 = vector.load %arg6[%c0_12, %c0_13] : memref<8x64xf32, #tpu.memory_space<vmem>>, vector<8x64xf32>
    tpu.vector_store %arg6[%c0_12, %c0_13], %14 {strides = array<i32>} : memref<8x64xf32, #tpu.memory_space<vmem>>, vector<8x64xf32>,
    return
  }
  func.func @transform_0(%arg0: i32) -> (i32, i32) {
    %c0_i32 = arith.constant 0 : i32
    %c0_i32_0 = arith.constant 0 : i32
    return %arg0, %c0_i32 : i32, i32
  }
  func.func @transform_1(%arg0: i32) -> (i32, i32) {
    %c0_i32 = arith.constant 0 : i32
    %c0_i32_0 = arith.constant 0 : i32
    %c0_i32_1 = arith.constant 0 : i32
    return %c0_i32, %c0_i32_0 : i32, i32
  }
  func.func @transform_2(%arg0: i32) -> (i32, i32) {
    %c0_i32 = arith.constant 0 : i32
    %c0_i32_0 = arith.constant 0 : i32
    %c0_i32_1 = arith.constant 0 : i32
    return %c0_i32, %c0_i32_0 : i32, i32
  }
  func.func @transform_3(%arg0: i32) -> (i32, i32) {
    %c0_i32 = arith.constant 0 : i32
    %c0_i32_0 = arith.constant 0 : i32
    %c0_i32_1 = arith.constant 0 : i32
    return %c0_i32, %c0_i32_0 : i32, i32
  }
  func.func @transform_4(%arg0: i32) -> (i32, i32) {
    %c0_i32 = arith.constant 0 : i32
    %c0_i32_0 = arith.constant 0 : i32
    %c0_i32_1 = arith.constant 0 : i32
    return %c0_i32, %c0_i32_0 : i32, i32
  }
  func.func @transform_5(%arg0: i32) -> (i32, i32) {
    %c0_i32 = arith.constant 0 : i32
    %c0_i32_0 = arith.constant 0 : i32
    return %arg0, %c0_i32 : i32, i32
  }
}

</mosaic_0001>

<bundles_post_ra>
// kernel: tpu_custom_call.1
= control target key start
LH: loop header
LB: loop body
LE: loop exit
PB: predicated region body
PF: predicated region fallthrough
CT: control target
= control target key end

     0   :  { %10 = vsyncpa [#allocation3], 0  ;;  %s922_s0 = inlined_call_operand.vmem [shape: f32[10,147], index: 0, kind: input, shape index: {}]   ;;  %s923_s1 = inlined_call_operand.vmem [shape: f32[147,64], index: 1, kind: input, shape index: {}]   ;;  %s924_s2 = inlined_call_operand.vmem [shape: f32[1,64], index: 2, kind: input, shape index: {}]   ;;  %s925_s3 = inlined_call_operand.vmem [shape: f32[64,64], index: 3, kind: input, shape index: {}]   ;;  %s926_s4 = inlined_call_operand.vmem [shape: f32[1,64], index: 4, kind: input, shape index: {}]   ;;  %s927_s5 = inlined_call_operand.hbm [shape: f32[10,64], index: 5, kind: output, shape index: {}]  }
   0x1   :  { %12 = vsyncpa [#allocation3 + $0x1], 0  ;;  %s718_s18 = smov 0   ;;  %s720_s19 = smov 0  }
   0x2   :  { %s722_s20 = smov 0   ;;  %s724_s21 = smov 0  }
   0x3 LB: > { %s739_s22 = sadd.s32 4294967295, %s682_s21   ;;  %s494_s23 = sadd.s32 4294967294, %s682_s21   ;;  %s682_s21 = sphi %s724_s21, %s933_s21   ;;  %s678_s20 = sphi %s722_s20, %s932_s20   ;;  %s674_s19 = sphi %s720_s19, %s931_s19   ;;  %s670_s18 = sphi %s718_s18, %s930_s18  }
   0x4   : > { %s743_s24 = sadd.s32 1, %s682_s21   ;;  %s135_s25 = sadd.s32 1, %s678_s20 }
   0x5   : > { %s132_s26 = ssub.s32 %s682_s21, %s743_s24  ;;  %p145_p0 = scmp.ne.s32.totalorder %s678_s20, %s674_s19 }
   0x6   : > { %p133_p1 = scmp.eq.s32.totalorder %s132_s26, 0  ;;  %p146_p2 = scmp.eq.s32.totalorder %s739_s22, 1 }
   0x7   : > { %p151_p3 = scmp.ne.s32.totalorder %s674_s19, %s670_s18  ;;  %p152_p4 = scmp.eq.s32.totalorder %s494_s23, 1 }
   0x8   : > { %s754_s27 = scalar_select %p133_p1, %s678_s20, %s135_s25  }
   0x9   : > { %p756_p5 = por %p146_p2, %p145_p0  ;;  %p760_p6 = por %p152_p4, %p151_p3 }
   0xa   : > { %p497_p7 = scmp.ge.s32.totalorder %s682_s21, 1  ;;  %p190_p8 = scmp.lt.s32.totalorder %s682_s21, 3 }
   0xc   : > { %p191_p9 = pnand %p497_p7, %p190_p8 }
   0xd   : > { %v225_v0 = vld [vmem:[%s923_s1] sm:$0xff] (!%p191_p9)  ;;  %v226_v1 = vld [vmem:[%s923_s1 + $0x8] sm:$0xff] (!%p191_p9)  ;;  %v227_v2 = vld [vmem:[%s923_s1 + $0x10] sm:$0xff] (!%p191_p9)  ;;  %v684_v3 = vmov (!%p191_p9), 0.0|0.0   ;;  %p218_p10 = scmp.lt.s32.totalorder (!%p191_p9), %s739_s22, 1  ;;  %vm251_vm0 = vcmask (!%p191_p9), 154624  }
   0xe   : > { %194 = sbr.rel (%p191_p9) target bundleno = 499 (0x1f3), region = 40  ;;  %539 = vmatprep.subr.bf16.mxu0 (!%p191_p9), %v684_v3  ;;  %v540_v4 = vpack.c.bf16 (!%p191_p9), %v226_v1, %v225_v0  ;;  %v228_v5 = vld [vmem:[%s923_s1 + $0x18] sm:$0xff] (!%p191_p9)  ;;  %566 = vmatprep.subr.bf16.mxu1 (!%p191_p9), %v684_v3  ;;  %v229_v7 = vld [vmem:[%s923_s1 + $0x20] sm:$0xff] (!%p191_p9)  ;;  %v230_v8 = vld [vmem:[%s923_s1 + $0x28] sm:$0xff] (!%p191_p9)  ;;  %v685_v38 = vmov (!%p191_p9), 0.0   ;;  %vm255_vm1 = vcmask (!%p191_p9), 1042432  }
   0xf   : > { %v543_v6 = vpack.c.bf16 (!%p191_p9), %v228_v5, %v227_v2  ;;  %v330_v9 = vld [vmem:[%s925_s3] sm:$0xff] (!%p191_p9)  ;;  %v331_v10 = vld [vmem:[%s925_s3 + $0x8] sm:$0xff] (!%p191_p9)  ;;  %v546_v11 = vpack.c.bf16 (!%p191_p9), %v230_v8, %v229_v7  ;;  %v332_v14 = vld [vmem:[%s925_s3 + $0x10] sm:$0xff] (!%p191_p9)  ;;  %vm686_vm2 = vmmov (!%p191_p9), 0   ;;  %vm345_vm3 = vcmask (!%p191_p9), 523264   ;;  %s507_s8 = sshll.u32 (!%p191_p9), %s739_s22, 7 }
  0x10   : > { %541 = vmatpush1.bf16.msra.mxu0 (!%p191_p9), %v540_v4  ;;  %v567_v13 = vpack.c.bf16 (!%p191_p9), %v331_v10, %v330_v9  ;;  %v231_v15 = vld [vmem:[%s923_s1 + $0x30] sm:$0xff] (!%p191_p9)  ;;  %v232_v16 = vld [vmem:[%s923_s1 + $0x38] sm:$0xff] (!%p191_p9)  ;;  %v334_v19 = vld [vmem:[%s925_s3 + $0x20] sm:$0xff] (!%p191_p9)  ;;  %536 = vmatprep.mubr.msk.f32.mxu1 (!%p191_p9), %vm686_vm2, %v685_v38 }
  0x11   : > { %542 = vmatprep.subr.bf16.mxu0 (!%p191_p9), %v684_v3  ;;  %v333_v17 = vld [vmem:[%s925_s3 + $0x18] sm:$0xff] (!%p191_p9)  ;;  %v335_v20 = vld [vmem:[%s925_s3 + $0x28] sm:$0xff] (!%p191_p9)  ;;  %v549_v21 = vpack.c.bf16 (!%p191_p9), %v232_v16, %v231_v15  ;;  %v233_v22 = vld [vmem:[%s923_s1 + $0x40] sm:$0xff] (!%p191_p9) }
  0x12   : > { %568 = vmatpush3.bf16.msra.mxu1 (!%p191_p9), %v567_v13  ;;  %v570_v18 = vpack.c.bf16 (!%p191_p9), %v333_v17, %v332_v14  ;;  %v234_v23 = vld [vmem:[%s923_s1 + $0x48] sm:$0xff] (!%p191_p9)  ;;  %v573_v24 = vpack.c.bf16 (!%p191_p9), %v335_v20, %v334_v19  ;;  %v235_v26 = vld [vmem:[%s923_s1 + $0x50] sm:$0xff] (!%p191_p9)  ;;  %v236_v27 = vld [vmem:[%s923_s1 + $0x58] sm:$0xff] (!%p191_p9) }
  0x13   : > { %569 = vmatprep.subr.bf16.mxu1 (!%p191_p9), %v684_v3  ;;  %v552_v25 = vpack.c.bf16 (!%p191_p9), %v234_v23, %v233_v22  ;;  %v555_v28 = vpack.c.bf16 (!%p191_p9), %v236_v27, %v235_v26  ;;  %v237_v29 = vld [vmem:[%s923_s1 + $0x60] sm:$0xff] (!%p191_p9)  ;;  %v238_v30 = vld [vmem:[%s923_s1 + $0x68] sm:$0xff] (!%p191_p9)  ;;  %v239_v32 = vld [vmem:[%s923_s1 + $0x70] sm:$0xff] (!%p191_p9) }
  0x14   : > { %544 = vmatpush1.bf16.msra.mxu0 (!%p191_p9), %v543_v6  ;;  %v558_v31 = vpack.c.bf16 (!%p191_p9), %v238_v30, %v237_v29  ;;  %v240_v33 = vld [vmem:[%s923_s1 + $0x78] sm:$0xff] (!%p191_p9)  ;;  %v241_v35 = vld [vmem:[%s923_s1 + $0x80] sm:$0xff] (!%p191_p9)  ;;  %v242_v36 = vld [vmem:[%s923_s1 + $0x88] sm:$0xff] (!%p191_p9) }
  0x15   : > { %s219_s13 = scalar_select %p218_p10, %s739_s22, 1  ;;  %545 = vmatprep.subr.bf16.mxu0 %v684_v3  ;;  %v561_v34 = vpack.c.bf16 %v240_v33, %v239_v32  ;;  %v564_v37 = vpack.c.bf16 %v242_v36, %v241_v35  ;;  %v243_v39 = vld [vmem:[%s923_s1 + $0x90] sm:$0x7]  ;;  %v337_v42 = vld [vmem:[%s925_s3 + $0x38] sm:$0xff]  ;;  %v501_v44 = vld [vmem:[%s924_s2] ss:$0 sm:$0xff] }
  0x16   : > { %571 = vmatpush3.bf16.msra.mxu1 %v570_v18  ;;  %v336_v41 = vld [vmem:[%s925_s3 + $0x30] sm:$0xff]  ;;  %v504_v49 = vld [vmem:[%s926_s4] ss:$0 sm:$0xff]  ;;  %s687_s22 = smov [#allocation2]  }
  0x17   : > { %s510_s23 = sshll.u32 %s219_s13, 4  ;;  %572 = vmatprep.subr.bf16.mxu1 %v684_v3  ;;  %v576_v43 = vpack.c.bf16 %v337_v42, %v336_v41  ;;  %s880_s13 = scalar_lea.hbm %s927_s5, %s507_s8 }
  0x18   : > { %s792_s30 = scalar_lea.vmem %s922_s0, %s510_s23  ;;  %547 = vmatpush1.bf16.msra.mxu0 %v546_v11  ;;  %s624_s16 = sshll.u32 %s687_s22, 4  ;;  %s625_s16 = int_to_ptr.vmem [resolvable:$false] %s624_s16 }
  0x19   : > { %v224_v12 = vld [vmem:[%s792_s30 + $0x8] sm:$0xff]  ;;  %548 = vmatprep.subr.bf16.mxu0 %v684_v3  ;;  %v223_v40 = vld [vmem:[%s792_s30] sm:$0xff]  ;;  %s215_s30 = sand.u32 1, %s674_s19   ;;  %s626_s17 = scalar_lea.vmem %s625_s16, 256 }
  0x1a   : > { %503 = vmatprep.mubr.msk.f32.mxu0 %vm251_vm0, %v224_v12  ;;  %574 = vmatpush3.bf16.msra.mxu1 %v573_v24  ;;  %s498_s26 = sshll.u32 %s215_s30, 3  ;;  %s422_s14 = scalar_lea.sflag [#allocation3], %s215_s30 }
  0x1b   : > { %575 = vmatprep.subr.bf16.mxu1 %v684_v3  ;;  %s217_s9 = scalar_lea.vmem [#allocation2], %s498_s26 }
  0x1c   : > { %550 = vmatpush1.bf16.msra.mxu0 %v549_v21  ;;  %s435_s10 = sshll.u32 %s217_s9, 4  ;;  %s882_s10 = int_to_ptr.vmem [resolvable:$true] %s435_s10 }
  0x1d   : > { %551 = vmatprep.subr.bf16.mxu0 %v684_v3  ;;  %s620_s15 = scalar_lea.vmem %s882_s10, 128  ;;  %p627_p0 = scmp.lt.s32.totalorder %s882_s10, %s625_s16 }
  0x1e   : > { %577 = vmatpush3.bf16.msra.mxu1 %v576_v43  ;;  %p621_p11 = scmp.ne.s32.totalorder %s882_s10, %s620_s15  ;;  %p628_p1 = scmp.lt.s32.totalorder %s626_s17, %s620_s15 }
  0x20   : > { %553 = vmatpush1.bf16.msra.mxu0 %v552_v25  ;;  %p622_p12 = pnand %p621_p11, %p756_p5  ;;  %p629_p2 = por %p628_p1, %p627_p0 }
  0x21   : > { %554 = vmatprep.subr.bf16.mxu0 %v684_v3 }
  0x22   : > { %p623_p13 = pneg %p622_p12 }
  0x24   : > { %556 = vmatpush1.bf16.msra.mxu0 %v555_v28  ;;  %p630_p3 = pnand %p629_p2, %p623_p13 }
  0x25   : > { %557 = vmatprep.subr.bf16.mxu0 %v684_v3 }
  0x28   : > { %559 = vmatpush1.bf16.msra.mxu0 %v558_v31 }
  0x29   : > { %560 = vmatprep.subr.bf16.mxu0 %v684_v3 }
  0x2c   : > { %562 = vmatpush1.bf16.msra.mxu0 %v561_v34 }
  0x2d   : > { %563 = vmatprep.subr.bf16.mxu0 %v684_v3 }
  0x30   : > { %565 = vmatpush1.bf16.msra.mxu0 %v564_v37 }
  0x31   : > { %295 = vmatprep.subr.mxu0 %v685_v38 }
  0x34   : > { %502 = vmatpush1.msk.msra.mxu0 %vm255_vm1, %v243_v39 }
  0x35   : > { %324 = vmatmul.mubr.f32.vlgmr.msra.gmra.mrb[0].mxu0 %v223_v40 }
 0x108   : > { %v325_v45 = vpop.f32.mrb[0].mxu0 }
 0x109   : > { %v326_v46 = vadd.f32 %v501_v44, %v325_v45  ;;  %v327_v47 = vpop.f32.mrb[1].mxu0 }
 0x10b   : > { %v329_v48 = vmax.f32 %v326_v46, 0.0 }
 0x10d   : > { %537 = vmatmul.mubr.msk.f32.vlgmr.msra.gmra.mrb[0].mxu1 %vm345_vm3, %v329_v48 }
 0x1e0   : > { %v415_v50 = vpop.f32.mrb[0].mxu1 }
 0x1e1   : > { %v416_v51 = vadd.f32 %v504_v49, %v415_v50  ;;  %v538_v52 = vpop.f32.mrb[1].mxu1 }
 0x1e3   : > { %v419_v53 = vmax.f32 %v416_v51, 0.0 }
 0x1e5   : > { %420 = vst.msk [vmem:[%s217_s9] sm:$0xff] %vm345_vm3, %v419_v53 }
 0x1e6   : > { %633 = shalt.err (!%p630_p3)
}
 0x1e7   : > { %s634_s23 = scalar_lea.hbm %s880_s13, 128  ;;  %s638_s26 = scalar_lea.hbm %s927_s5, 256 }
 0x1e8   : > { %p635_p4 = scmp.ne.s32.totalorder %s880_s13, %s634_s23  ;;  %p639_p9 = scmp.lt.u32.totalorder %s880_s13, %s927_s5 }
 0x1e9   : > { %p640_p10 = scmp.lt.u32.totalorder %s638_s26, %s634_s23  ;;  %p642_p12 = scmp.lt.u32.totalorder %s634_s23, %s880_s13 }
 0x1ea   : > { %p636_p7 = pnand %p635_p4, %p756_p5 }
 0x1eb   : > { %p641_p11 = por %p640_p10, %p639_p9 }
 0x1ec   : > { %p637_p8 = pneg %p636_p7 }
 0x1ed   : > { %p643_p13 = por %p642_p12, %p641_p11 }
 0x1ef   : > { %p644_p0 = pnand %p643_p13, %p637_p8 }
 0x1f1   : > { %647 = shalt.err (!%p644_p0)
}
 0x1f2   : > { %578 = dma.vmem_to_hbm [thread:$0]  (%p756_p5), %s882_s10, 128, %s880_s13, %s422_s14  }
 0x1f3 PF: > { %p584_p1 = scmp.ge.s32.totalorder %s682_s21, 2  ;;  %s447_s8 = sand.u32 1, %s670_s18  }
 0x1f4   : > { %s448_s9 = scalar_lea.sflag [#allocation3], %s447_s8 }
 0x1f5   : > { %p581_p2 = pnand %p584_p1, %p760_p6 }
 0x1f7   : > { %665 = dma.done.wait (!%p581_p2), %s448_s9, 128  }
 0x1f8   : > { %667 = vsyncadd (!%p581_p2), %s448_s9, 4294967168  ;;  %p15_p3 = scmp.ge.s32.totalorder %s743_s24, 4   ;;  %s930_s18 = smov %s674_s19 }
 0x1f9   : > { %s931_s19 = smov %s678_s20  ;;  %s932_s20 = smov %s754_s27 }
 0x1fa   : > { %s933_s21 = smov %s743_s24  ;;  %17 = sbr.rel (!%p15_p3) target bundleno = 3 (0x3), region = 75 }
 0x201   :  { %453 = vsyncpa [#allocation3], 1 }
 0x202   :  { %455 = vsyncpa [#allocation3 + $0x1], 1 }

</bundles_post_ra>
